<compile_context>
chip_gen: v7x
topology: tpu7x:2x2x1
jax: 0.10.0
libtpu: 0.0.40
codegen_flags: <defaults>
</compile_context>

<pallas_src>
import functools

import jax
import jax.numpy as jnp
import numpy as np
from jax.experimental import pallas as pl
from jax.experimental.pallas import tpu as pltpu


# ---------------------------------------------------------------- kernel -----

def _fused_tgc_kernel(x_ref, a_ref, gbias_ref, w_ref, bias2_ref, o_ref):
    # Stage 1: graph convolution  g = relu(x @ A_tile + gbias)        (B, tile_l*C)
    g = jnp.dot(x_ref[...], a_ref[...], preferred_element_type=jnp.float32)
    g = jnp.maximum(g + gbias_ref[...], 0.0)
    # Stage 2 (fused, g stays in VMEM): folded conv+BN as block-diagonal matmul
    #   z = relu(g @ W_blockdiag + b_eff)                             (B, tile_l*OC)
    z = jnp.dot(g, w_ref[...], preferred_element_type=jnp.float32)
    o_ref[...] = jnp.maximum(z + bias2_ref[...], 0.0)


# ------------------------------------------------------------- pallas_call ---

def fused_tgc_pallas(x, a2, gbias_full, w_blk, b_blk, *, L, C, OC, tile_l):
    B = x.shape[0]                  # already padded to a multiple of 8 by the wrapper
    K = L * C                       # flattened graph-conv output width
    n_tiles = L // tile_l
    tkc = tile_l * C                # columns of A per grid step
    tko = tile_l * OC               # output columns per grid step (lane-dense)

    flops = 2 * B * L * K + 2 * B * tkc * tko * n_tiles
    bytes_accessed = 4 * (B * L + L * K + K + tkc * tko + tko + B * L * OC)

    return pl.pallas_call(
        _fused_tgc_kernel,
        out_shape=jax.ShapeDtypeStruct((B, L * OC), jnp.float32),
        grid=(n_tiles,),
        in_specs=[
            pl.BlockSpec((B, L), lambda i: (0, 0)),      # x: whole batch / graph
            pl.BlockSpec((L, tkc), lambda i: (0, i)),    # column tile of weighted adjacency
            pl.BlockSpec((1, tkc), lambda i: (0, i)),    # graph-conv bias tile
            pl.BlockSpec((tkc, tko), lambda i: (0, 0)),  # block-diag folded conv/BN weight
            pl.BlockSpec((1, tko), lambda i: (0, 0)),    # folded conv/BN bias
        ],
        out_specs=pl.BlockSpec((B, tko), lambda i: (0, i)),
        compiler_params=pltpu.CompilerParams(dimension_semantics=("parallel",)),
        cost_estimate=pl.CostEstimate(flops=flops, transcendentals=0,
                                      bytes_accessed=bytes_accessed),
    )(x, a2, gbias_full, w_blk, b_blk)


# ------------------------------------------------- parameter preprocessing ---

def prepare_params(params, *, tile_l=None):
    """Hoisted, parameter-only preprocessing (run once, not per forward call)."""
    adj, weight = params["adj"], params["weight"]
    gc_bias, conv_w, conv_b = params["gc_bias"], params["conv_w"], params["conv_b"]
    bn = params["bn"]

    L, _, W, R = adj.shape
    C = W * R
    OC = conv_w.shape[0]
    if tile_l is None:
        tile_l = L                                  # one full block at small L
    assert L % tile_l == 0

    weighted = (adj * weight).astype(jnp.float32)
    a2 = weighted.reshape(L, L * C)                 # columns flattened as (l, w, r)
    gbias_pat = gc_bias.T.reshape(-1)               # index w*R + r -> bias[r, w]
    gbias_full = jnp.tile(gbias_pat, L).reshape(1, L * C)

    # Fold eval-mode BatchNorm + conv bias into the conv weights (float32).
    scale = bn["gamma"] / jnp.sqrt(bn["var"] + 1e-5)            # (OC,)
    w_eff = conv_w.reshape(OC, C).T * scale[None, :]            # (C, OC)
    b_eff = (conv_b - bn["mean"]) * scale + bn["beta"]          # (OC,)

    # Per-tile block-diagonal weight: W_blk[l*C+c, l2*OC+o] = delta(l,l2) * w_eff[c,o]
    eye = jnp.eye(tile_l, dtype=jnp.float32)
    w_blk = (eye[:, None, :, None] * w_eff[None, :, None, :]).reshape(
        tile_l * C, tile_l * OC)
    b_blk = jnp.tile(b_eff, tile_l).reshape(1, tile_l * OC)

    meta = dict(L=L, C=C, OC=OC, tile_l=tile_l)
    return (a2, gbias_full, w_blk, b_blk), meta


# ---------------------------------------------------------------- forward ----

@functools.partial(jax.jit, static_argnames=("L", "C", "OC", "tile_l"))
def traffic_graph_convolution(x, a2, gbias_full, w_blk, b_blk, *, L, C, OC, tile_l):
    B = x.shape[0]
    # Pad batch to a sublane multiple so every VMEM tile is register-aligned
    # (unmasked vld/vst); padded rows are zeros and are sliced away for free.
    Bp = ((B + 7) // 8) * 8
    xp = x if Bp == B else jnp.pad(x, ((0, Bp - B), (0, 0)))
    z = fused_tgc_pallas(xp, a2, gbias_full, w_blk, b_blk,
                         L=L, C=C, OC=OC, tile_l=tile_l)       # (Bp, L*OC), lane-dense
    return z[:B].reshape(B, L, OC)                              # == PyTorch permute(0,2,1)


# -------------------------------------------------------------- reference ----

def reference(x, params):
    """Pure-JAX mirror of the PyTorch forward (eval mode)."""
    adj, weight = params["adj"], params["weight"]
    gc_bias, conv_w, conv_b = params["gc_bias"], params["conv_w"], params["conv_b"]
    bn = params["bn"]
    L, _, W, R = adj.shape
    B = x.shape[0]
    OC = conv_w.shape[0]
    weighted = adj * weight
    outs = []
    x_t = x.T                                                    # (L, B)
    for r in range(R):
        gc = weighted[:, :, :, r].reshape(L, L * W).T @ x_t      # (L*W, B)
        gc = gc.T.reshape(B, L, W)
        gc = jnp.maximum(gc + gc_bias[r, :], 0.0)
        outs.append(gc)
    out = jnp.stack(outs, axis=3).reshape(B, L, W * R)
    z = jnp.einsum("blc,oc->blo", out, conv_w.reshape(OC, W * R)) + conv_b
    z = (z - bn["mean"]) / jnp.sqrt(bn["var"] + 1e-5) * bn["gamma"] + bn["beta"]
    return jnp.maximum(z, 0.0)


# ------------------------------------------------------------------- main ----

if __name__ == "__main__":
    # Small shapes consistent with the module.
    L, W, R = 16, 4, 3       # n_links, num_weights, n_neighbor
    B, OC = 8, 8             # batch, out_channels
    C = W * R

    key = jax.random.PRNGKey(0)
    keys = jax.random.split(key, 10)

    stdv = 1.0 / np.sqrt(L)
    params = {
        "adj": (jax.random.uniform(keys[0], (L, L, W, R)) < 0.3).astype(jnp.float32),
        "weight": jax.random.uniform(keys[1], (L, L, W, R), minval=-stdv, maxval=stdv),
        "gc_bias": jax.random.uniform(keys[2], (R, W), minval=-stdv, maxval=stdv),
        "conv_w": jax.random.uniform(keys[3], (OC, 1, 1, C),
                                     minval=-1.0 / np.sqrt(C), maxval=1.0 / np.sqrt(C)),
        "conv_b": jax.random.uniform(keys[4], (OC,),
                                     minval=-1.0 / np.sqrt(C), maxval=1.0 / np.sqrt(C)),
        "bn": {  # eval-mode running stats + affine (non-trivial, to exercise BN folding)
            "mean": 0.1 * jax.random.normal(keys[5], (OC,), jnp.float32),
            "var": jax.random.uniform(keys[6], (OC,), minval=0.5, maxval=1.5),
            "gamma": jax.random.uniform(keys[7], (OC,), minval=0.5, maxval=1.5),
            "beta": 0.1 * jax.random.normal(keys[8], (OC,), jnp.float32),
        },
    }
    x = jax.random.normal(keys[9], (B, L), dtype=jnp.float32)

    # Parameter preprocessing hoisted out of the per-call path.
    (a2, gbias_full, w_blk, b_blk), meta = prepare_params(params)

    out = traffic_graph_convolution(x, a2, gbias_full, w_blk, b_blk, **meta)
    out = jax.block_until_ready(out)

    ref = jax.block_until_ready(reference(x, params))
    assert out.shape == (B, L, OC), out.shape
    np.testing.assert_allclose(np.asarray(out), np.asarray(ref), rtol=2e-5, atol=2e-5)

    print("KERNEL_OK")
</pallas_src>

<mosaic_0001>
module attributes {stable_mosaic.version = 11 : i64} {
  func.func @_fused_tgc_kernel(%arg0: i32, %arg1: memref<8x16xf32, #tpu.memory_space<vmem>>, %arg2: memref<16x192xf32, #tpu.memory_space<vmem>>, %arg3: memref<1x192xf32, #tpu.memory_space<vmem>>, %arg4: memref<192x128xf32, #tpu.memory_space<vmem>>, %arg5: memref<1x128xf32, #tpu.memory_space<vmem>>, %arg6: memref<8x128xf32, #tpu.memory_space<vmem>>) attributes {dimension_semantics = [#tpu.dimension_semantics<parallel>], iteration_bounds = array<i64: 1>, scalar_prefetch = 0 : i64, scratch_operands = 0 : i64, tpu.core_type = #tpu.core_type<tc>, window_params = [{pipeline_mode = #tpu.pipeline_mode<synchronous>, transform_indices = @transform_0, window_bounds = array<i64: 8, 16>}, {transform_indices = @transform_1, window_bounds = array<i64: 16, 192>}, {transform_indices = @transform_2, window_bounds = array<i64: 1, 192>}, {pipeline_mode = #tpu.pipeline_mode<synchronous>, transform_indices = @transform_3, window_bounds = array<i64: 192, 128>}, {pipeline_mode = #tpu.pipeline_mode<synchronous>, transform_indices = @transform_4, window_bounds = array<i64: 1, 128>}, {transform_indices = @transform_5, window_bounds = array<i64: 8, 128>}]} {
    %c0 = arith.constant 0 : index
    %c0_0 = arith.constant 0 : index
    %0 = vector.load %arg1[%c0, %c0_0] : memref<8x16xf32, #tpu.memory_space<vmem>>, vector<8x16xf32>
    %c0_1 = arith.constant 0 : index
    %c0_2 = arith.constant 0 : index
    %1 = vector.load %arg2[%c0_1, %c0_2] : memref<16x192xf32, #tpu.memory_space<vmem>>, vector<16x192xf32>
    %cst = arith.constant dense<0.000000e+00> : vector<8x192xf32>
    %2 = tpu.matmul %0, %1, %cst {dimension_numbers = #tpu.dot_dimension_numbers<[1], [0], [0], [1], [0, 0, 1, 1], [], []>} : vector<8x16xf32>, vector<16x192xf32>, vector<8x192xf32> -> vector<8x192xf32>
    %c0_3 = arith.constant 0 : index
    %c0_4 = arith.constant 0 : index
    %3 = vector.load %arg3[%c0_3, %c0_4] : memref<1x192xf32, #tpu.memory_space<vmem>>, vector<1x192xf32>
    %4 = vector.broadcast %3 : vector<1x192xf32> to vector<8x192xf32>
    %5 = arith.addf %2, %4 : vector<8x192xf32>
    %cst_5 = arith.constant 0.000000e+00 : f32
    %6 = vector.broadcast %cst_5 : f32 to vector<8x192xf32>
    %7 = arith.maximumf %5, %6 : vector<8x192xf32>
    %c0_6 = arith.constant 0 : index
    %c0_7 = arith.constant 0 : index
    %8 = vector.load %arg4[%c0_6, %c0_7] : memref<192x128xf32, #tpu.memory_space<vmem>>, vector<192x128xf32>
    %cst_8 = arith.constant dense<0.000000e+00> : vector<8x128xf32>
    %9 = tpu.matmul %7, %8, %cst_8 {dimension_numbers = #tpu.dot_dimension_numbers<[1], [0], [0], [1], [0, 0, 1, 1], [], []>} : vector<8x192xf32>, vector<192x128xf32>, vector<8x128xf32> -> vector<8x128xf32>
    %c0_9 = arith.constant 0 : index
    %c0_10 = arith.constant 0 : index
    %10 = vector.load %arg5[%c0_9, %c0_10] : memref<1x128xf32, #tpu.memory_space<vmem>>, vector<1x128xf32>
    %11 = vector.broadcast %10 : vector<1x128xf32> to vector<8x128xf32>
    %12 = arith.addf %9, %11 : vector<8x128xf32>
    %cst_11 = arith.constant 0.000000e+00 : f32
    %13 = vector.broadcast %cst_11 : f32 to vector<8x128xf32>
    %14 = arith.maximumf %12, %13 : vector<8x128xf32>
    %c0_12 = arith.constant 0 : index
    %c0_13 = arith.constant 0 : index
    %15 = vector.load %arg6[%c0_12, %c0_13] : memref<8x128xf32, #tpu.memory_space<vmem>>, vector<8x128xf32>
    tpu.vector_store %arg6[%c0_12, %c0_13], %14 {strides = array<i32>} : memref<8x128xf32, #tpu.memory_space<vmem>>, vector<8x128xf32>,
    return
  }
  func.func @transform_0(%arg0: i32) -> (i32, i32) {
    %c0_i32 = arith.constant 0 : i32
    %c0_i32_0 = arith.constant 0 : i32
    %c0_i32_1 = arith.constant 0 : i32
    return %c0_i32, %c0_i32_0 : i32, i32
  }
  func.func @transform_1(%arg0: i32) -> (i32, i32) {
    %c0_i32 = arith.constant 0 : i32
    %c0_i32_0 = arith.constant 0 : i32
    return %c0_i32, %arg0 : i32, i32
  }
  func.func @transform_2(%arg0: i32) -> (i32, i32) {
    %c0_i32 = arith.constant 0 : i32
    %c0_i32_0 = arith.constant 0 : i32
    return %c0_i32, %arg0 : i32, i32
  }
  func.func @transform_3(%arg0: i32) -> (i32, i32) {
    %c0_i32 = arith.constant 0 : i32
    %c0_i32_0 = arith.constant 0 : i32
    %c0_i32_1 = arith.constant 0 : i32
    return %c0_i32, %c0_i32_0 : i32, i32
  }
  func.func @transform_4(%arg0: i32) -> (i32, i32) {
    %c0_i32 = arith.constant 0 : i32
    %c0_i32_0 = arith.constant 0 : i32
    %c0_i32_1 = arith.constant 0 : i32
    return %c0_i32, %c0_i32_0 : i32, i32
  }
  func.func @transform_5(%arg0: i32) -> (i32, i32) {
    %c0_i32 = arith.constant 0 : i32
    %c0_i32_0 = arith.constant 0 : i32
    return %c0_i32, %arg0 : i32, i32
  }
}

</mosaic_0001>

<bundles_post_ra>
// kernel: traffic_graph_convolution.1
= control target key start
LH: loop header
LB: loop body
LE: loop exit
PB: predicated region body
PF: predicated region fallthrough
CT: control target
= control target key end

     0   :  { %10 = vsyncpa [#allocation3], 0  ;;  %s484_s0 = inlined_call_operand.hbm [shape: f32[8,16], index: 0, kind: input, shape index: {}]   ;;  %s485_s1 = inlined_call_operand.hbm [shape: f32[16,192], index: 1, kind: input, shape index: {}]   ;;  %s486_s2 = inlined_call_operand.vmem [shape: f32[1,192], index: 2, kind: input, shape index: {}]   ;;  %s487_s3 = inlined_call_operand.hbm [shape: f32[192,128], index: 3, kind: input, shape index: {}]   ;;  %s488_s4 = inlined_call_operand.vmem [shape: f32[1,128], index: 4, kind: input, shape index: {}]   ;;  %s489_s5 = inlined_call_operand.vmem [shape: f32[8,128], index: 5, kind: output, shape index: {}]  }
   0x1   :  { %11 = vsyncpa [#allocation5], 0  ;;  %s388_s18 = smov [#allocation4]   ;;  %s318_s22 = scalar_lea.hbm %s485_s1, 512 }
   0x2   :  { %s27_s19 = sshll.u32 %s388_s18, 4  ;;  %p319_p0 = scmp.ne.s32.totalorder %s485_s1, %s318_s22  ;;  %s28_s19 = int_to_ptr.vmem [resolvable:$true] %s27_s19 }
   0x3   :  { %p322_p1 = scmp.lt.u32.totalorder %s318_s22, %s485_s1 }
   0x5   :  { %p324_p2 = pnand %p322_p1, %p319_p0 }
   0x7   :  { %327 = shalt.err (!%p324_p2)
}
   0x8   :  { %s328_s27 = scalar_lea.vmem %s28_s19, 512  ;;  %p333_p4 = scmp.lt.s32.totalorder %s28_s19, %s28_s19 }
   0x9   :  { %p329_p3 = scmp.ne.s32.totalorder %s28_s19, %s328_s27  ;;  %p334_p5 = scmp.lt.s32.totalorder %s328_s27, %s328_s27 }
   0xb   :  { %p335_p6 = por %p334_p5, %p333_p4 }
   0xd   :  { %p336_p7 = pnand %p335_p6, %p329_p3 }
   0xf   :  { %339 = shalt.err (!%p336_p7)
}
  0x10   :  { %s389_s28 = smov 256   ;;  %s390_s29 = smov 16  }
  0x11   :  { %33 = dma.hbm_to_vmem [thread:$0]  %s485_s1, 512, %s28_s19, [#allocation5], %s389_s28, %s389_s28, %s390_s29  }
  0x12   :  { %s391_s7 = smov [#allocation2]   ;;  %s392_s9 = smov [#allocation6]  }
  0x13   :  { %s18_s8 = sshll.u32 %s391_s7, 4  ;;  %s41_s10 = sshll.u32 %s392_s9, 4  ;;  %s19_s8 = int_to_ptr.vmem [resolvable:$true] %s18_s8  ;;  %s42_s10 = int_to_ptr.vmem [resolvable:$true] %s41_s10 }
  0x14   :  { %s340_s13 = scalar_lea.hbm %s484_s0, 128 }
  0x15   :  { %p341_p8 = scmp.ne.s32.totalorder %s484_s0, %s340_s13  ;;  %p344_p9 = scmp.lt.u32.totalorder %s340_s13, %s484_s0 }
  0x17   :  { %p346_p10 = pnand %p344_p9, %p341_p8 }
  0x19   :  { %349 = shalt.err (!%p346_p10)
}
  0x1a   :  { %s350_s1 = scalar_lea.vmem %s19_s8, 128  ;;  %p355_p12 = scmp.lt.s32.totalorder %s19_s8, %s19_s8 }
  0x1b   :  { %p351_p11 = scmp.ne.s32.totalorder %s19_s8, %s350_s1  ;;  %p356_p13 = scmp.lt.s32.totalorder %s350_s1, %s350_s1 }
  0x1d   :  { %p357_p0 = por %p356_p13, %p355_p12 }
  0x1f   :  { %p358_p1 = pnand %p357_p0, %p351_p11 }
  0x21   :  { %361 = shalt.err (!%p358_p1)
}
  0x22   :  { %21 = dma.hbm_to_vmem [thread:$0]  %s484_s0, 128, %s19_s8, [#allocation3]  }
  0x23   :  { %s362_s22 = scalar_lea.hbm %s487_s3, 3072 }
  0x24   :  { %p363_p2 = scmp.ne.s32.totalorder %s487_s3, %s362_s22  ;;  %p366_p3 = scmp.lt.u32.totalorder %s362_s22, %s487_s3 }
  0x26   :  { %p368_p4 = pnand %p366_p3, %p363_p2 }
  0x28   :  { %371 = shalt.err (!%p368_p4)
}
  0x29   :  { %s372_s27 = scalar_lea.vmem %s42_s10, 3072  ;;  %p377_p6 = scmp.lt.s32.totalorder %s42_s10, %s42_s10 }
  0x2a   :  { %p373_p5 = scmp.ne.s32.totalorder %s42_s10, %s372_s27  ;;  %p378_p7 = scmp.lt.s32.totalorder %s372_s27, %s372_s27 }
  0x2c   :  { %p379_p8 = por %p378_p7, %p377_p6 }
  0x2e   :  { %p380_p9 = pnand %p379_p8, %p373_p5 }
  0x30   :  { %383 = shalt.err (!%p380_p9)
}
  0x31   :  { %s393_s0 = smov 128   ;;  %s394_s28 = smov 8  }
  0x32   :  { %47 = dma.hbm_to_vmem [thread:$0]  %s487_s3, 3072, %s42_s10, [#allocation5], %s393_s0, %s393_s0, %s394_s28  }
  0x33   :  { %384 = dma.done.wait [#allocation3], 128  }
  0x34   :  { %385 = vsyncadd [#allocation3], 4294967168 }
  0x35   :  { %386 = dma.done.wait [#allocation5], 3584  }
  0x36   :  { %387 = vsyncadd [#allocation5], 4294963712  ;;  %v395_v0 = vmov 0.0   ;;  %v396_v1 = vmov 0.0|0.0   ;;  %v61_v2 = vld [vmem:[#allocation4 + $0x8] sm:$0xff]  ;;  %v63_v3 = vld [vmem:[#allocation4 + $0x18] sm:$0xff]  ;;  %v66_v45 = vlaneseq }
  0x37   :  { %144 = vmatprep.mubr.f32.mxu0 %v395_v0  ;;  %273 = vmatprep.subr.bf16.mxu1 %v396_v1  ;;  %v60_v4 = vld [vmem:[#allocation4] sm:$0xff]  ;;  %v269_v5 = vpack.c.bf16 %v63_v3, %v61_v2  ;;  %v62_v6 = vld [vmem:[#allocation4 + $0x10] sm:$0xff]  ;;  %v154_v9 = vld [vmem:[#allocation6 + $0x8] sm:$0xff]  ;;  %vm76_vm0 = vcmask 130048   ;;  %vm184_vm1 = vcmask 523264  }
  0x38   :  { %v153_v7 = vld [vmem:[#allocation6] sm:$0xff]  ;;  %v271_v8 = vpack.c.bf16 %v62_v6, %v60_v4  ;;  %v155_v10 = vld [vmem:[#allocation6 + $0x10] sm:$0xff]  ;;  %v156_v11 = vld [vmem:[#allocation6 + $0x18] sm:$0xff]  ;;  %v67_v46 = vshrl.u32 %v66_v45, 7 }
  0x39   :  { %270 = vmatprep.subr.bf16.mxu0 %v269_v5  ;;  %v274_v12 = vpack.c.bf16 %v154_v9, %v153_v7  ;;  %v59_v13 = vld [vmem:[#allocation2] sm:$0xff]  ;;  %v277_v14 = vpack.c.bf16 %v156_v11, %v155_v10  ;;  %v157_v15 = vld [vmem:[#allocation6 + $0x20] sm:$0xff]  ;;  %v158_v16 = vld [vmem:[#allocation6 + $0x28] sm:$0xff] }
  0x3a   :  { %272 = vmatpush1.bf16.msra.mxu0 %v271_v8  ;;  %v280_v17 = vpack.c.bf16 %v158_v16, %v157_v15  ;;  %v159_v18 = vld [vmem:[#allocation6 + $0x30] sm:$0xff]  ;;  %v160_v19 = vld [vmem:[#allocation6 + $0x38] sm:$0xff]  ;;  %v161_v21 = vld [vmem:[#allocation6 + $0x40] sm:$0xff]  ;;  %v68_v47 = vsub.s32 0, %v67_v46  ;;  %v72_v49 = vsub.s32 1, %v67_v46 }
  0x3b   :  { %275 = vmatpush1.bf16.msra.mxu1 %v274_v12  ;;  %v283_v20 = vpack.c.bf16 %v160_v19, %v159_v18  ;;  %v162_v22 = vld [vmem:[#allocation6 + $0x48] sm:$0xff]  ;;  %v163_v24 = vld [vmem:[#allocation6 + $0x50] sm:$0xff]  ;;  %v164_v25 = vld [vmem:[#allocation6 + $0x58] sm:$0xff] }
  0x3c   :  { %276 = vmatprep.subr.bf16.mxu1 %v396_v1  ;;  %v286_v23 = vpack.c.bf16 %v162_v22, %v161_v21  ;;  %v289_v26 = vpack.c.bf16 %v164_v25, %v163_v24  ;;  %v165_v27 = vld [vmem:[#allocation6 + $0x60] sm:$0xff]  ;;  %v166_v28 = vld [vmem:[#allocation6 + $0x68] sm:$0xff]  ;;  %v167_v30 = vld [vmem:[#allocation6 + $0x70] sm:$0xff] }
  0x3d   :  { %266 = vmatmul.mubr.msk.f32.vlgmr.msra.gmra.mrb[0].mxu0 %vm76_vm0, %v59_v13  ;;  %v292_v29 = vpack.c.bf16 %v166_v28, %v165_v27  ;;  %v168_v31 = vld [vmem:[#allocation6 + $0x78] sm:$0xff]  ;;  %v169_v33 = vld [vmem:[#allocation6 + $0x80] sm:$0xff]  ;;  %v170_v34 = vld [vmem:[#allocation6 + $0x88] sm:$0xff] }
  0x3e   :  { %v295_v32 = vpack.c.bf16 %v168_v31, %v167_v30  ;;  %v298_v35 = vpack.c.bf16 %v170_v34, %v169_v33  ;;  %v171_v36 = vld [vmem:[#allocation6 + $0x90] sm:$0xff]  ;;  %v172_v37 = vld [vmem:[#allocation6 + $0x98] sm:$0xff]  ;;  %v173_v39 = vld [vmem:[#allocation6 + $0xa0] sm:$0xff] }
  0x3f   :  { %278 = vmatpush1.bf16.msra.mxu1 %v277_v14  ;;  %v301_v38 = vpack.c.bf16 %v172_v37, %v171_v36  ;;  %v174_v40 = vld [vmem:[#allocation6 + $0xa8] sm:$0xff]  ;;  %v175_v42 = vld [vmem:[#allocation6 + $0xb0] sm:$0xff]  ;;  %v176_v43 = vld [vmem:[#allocation6 + $0xb8] sm:$0xff] }
  0x40   :  { %279 = vmatprep.subr.bf16.mxu1 %v396_v1  ;;  %v304_v41 = vpack.c.bf16 %v174_v40, %v173_v39  ;;  %v307_v44 = vpack.c.bf16 %v176_v43, %v175_v42  ;;  %v64_v48 = vld [vmem:[%s486_s2] sm:$0x3] }
  0x41   :  { %v69_v50 = vrot.slane %v64_v48, %v68_v47  ;;  %v73_v51 = vrot.slane %v64_v48, %v72_v49  ;;  %v267_v58 = vld [vmem:[%s488_s4] ss:$0 sm:$0xff] }
  0x43   :  { %281 = vmatpush1.bf16.msra.mxu1 %v280_v17 }
  0x44   :  { %282 = vmatprep.subr.bf16.mxu1 %v396_v1 }
  0x47   :  { %284 = vmatpush1.bf16.msra.mxu1 %v283_v20 }
  0x48   :  { %285 = vmatprep.subr.bf16.mxu1 %v396_v1 }
  0x4b   :  { %287 = vmatpush1.bf16.msra.mxu1 %v286_v23 }
  0x4c   :  { %288 = vmatprep.subr.bf16.mxu1 %v396_v1 }
  0x4f   :  { %290 = vmatpush1.bf16.msra.mxu1 %v289_v26 }
  0x50   :  { %291 = vmatprep.subr.bf16.mxu1 %v396_v1 }
  0x53   :  { %293 = vmatpush1.bf16.msra.mxu1 %v292_v29 }
  0x54   :  { %294 = vmatprep.subr.bf16.mxu1 %v396_v1 }
  0x57   :  { %296 = vmatpush1.bf16.msra.mxu1 %v295_v32 }
  0x58   :  { %297 = vmatprep.subr.bf16.mxu1 %v396_v1 }
  0x5b   :  { %299 = vmatpush1.bf16.msra.mxu1 %v298_v35 }
  0x5c   :  { %300 = vmatprep.subr.bf16.mxu1 %v396_v1 }
  0x5f   :  { %302 = vmatpush1.bf16.msra.mxu1 %v301_v38 }
  0x60   :  { %303 = vmatprep.subr.bf16.mxu1 %v396_v1 }
  0x63   :  { %305 = vmatpush1.bf16.msra.mxu1 %v304_v41 }
  0x64   :  { %306 = vmatprep.subr.bf16.mxu1 %v396_v1 }
  0x67   :  { %308 = vmatpush1.bf16.msra.mxu1 %v307_v44 }
 0x110   :  { %v146_v52 = vpop.f32.mrb[0].mxu0 }
 0x111   :  { %v147_v53 = vadd.f32 %v146_v52, %v69_v50  ;;  %v148_v54 = vpop.f32.mrb[1].mxu0 }
 0x112   :  { %v149_v55 = vadd.f32 %v148_v54, %v73_v51 }
 0x113   :  { %v151_v57 = vmax.f32 %v147_v53, 0.0 }
 0x114   :  { %v152_v56 = vmax.f32 %v149_v55, 0.0 }
 0x116   :  { %268 = vmatprep.mubr.msk.f32.mxu1 %vm184_vm1, %v152_v56 }
 0x117   :  { %253 = vmatmul.mubr.f32.vlgmr.msra.gmra.mrb[0].mxu1 %v151_v57 }
 0x1ea   :  { %v254_v59 = vpop.f32.mrb[0].mxu1 }
 0x1eb   :  { %v255_v60 = vadd.f32 %v267_v58, %v254_v59  ;;  %v256_v61 = vpop.f32.mrb[1].mxu1 }
 0x1ed   :  { %v258_v62 = vmax.f32 %v255_v60, 0.0 }
 0x1ef   :  { %259 = vst [vmem:[%s489_s5] sm:$0xff] %v258_v62 }
 0x1f0   :  { %264 = vsyncpa [#allocation3], 1 }
 0x1f1   :  { %265 = vsyncpa [#allocation5], 1 }

</bundles_post_ra>
